<compile_context>
chip_gen: v7x
topology: tpu7x:2x2x1
jax: 0.10.0
libtpu: 0.0.40
codegen_flags: <defaults>
</compile_context>

<pallas_src>
import jax
import jax.numpy as jnp
from jax import lax
from jax.experimental import pallas as pl
from jax.experimental.pallas import tpu as pltpu


def _round_up(x, m):
    return ((x + m - 1) // m) * m


def _linear_kernel(x_ref, v_ref, b_ref, o_ref, acc_ref):
    k = pl.program_id(2)

    # Init accumulator with the (broadcast) bias on the first K-step.
    @pl.when(k == 0)
    def _():
        acc_ref[...] = jnp.broadcast_to(
            b_ref[...].astype(jnp.float32), acc_ref.shape
        )

    # out[b, i] += sum_k x[b, k] * V[i, k]   (MXU, f32 accumulate)
    acc_ref[...] += lax.dot_general(
        x_ref[...],                      # (tm, tk)
        v_ref[...],                      # (tn, tk)  -- native (N, K) layout
        dimension_numbers=(((1,), (1,)), ((), ())),
        preferred_element_type=jnp.float32,
    )

    # Store once on the last K-step (single cast at the store).
    @pl.when(k == pl.num_programs(2) - 1)
    def _():
        o_ref[...] = acc_ref[...].astype(o_ref.dtype)


def one_word_tensor_regression(x, V, bias, *, tm=None, tn=None, tk=None):
    """x: (B, K), V: (N, K), bias: (N,)  ->  (B, N)."""
    B, K = x.shape
    N, K2 = V.shape
    assert K == K2, "input_dim mismatch"
    assert bias.shape == (N,), "bias shape mismatch"

    # Pad to TPU-friendly shapes: sublane multiple of 8 (f32), lane multiple of 128.
    Bp = _round_up(B, 8)
    Kp = _round_up(K, 128)
    Np = _round_up(N, 128)

    # Tile sizes: full padded dim up to a 512 cap (fits scoped VMEM on all gens).
    tm = min(Bp, 512) if tm is None else tm
    tn = min(Np, 512) if tn is None else tn
    tk = min(Kp, 512) if tk is None else tk
    Bp = _round_up(Bp, tm)
    Np = _round_up(Np, tn)
    Kp = _round_up(Kp, tk)

    xp = x if (Bp, Kp) == (B, K) else jnp.pad(x, ((0, Bp - B), (0, Kp - K)))
    Vp = V if (Np, Kp) == (N, K) else jnp.pad(V, ((0, Np - N), (0, Kp - K)))
    bp = (bias if Np == N else jnp.pad(bias, (0, Np - N))).reshape(1, Np)

    grid = (Bp // tm, Np // tn, Kp // tk)

    out_p = pl.pallas_call(
        _linear_kernel,
        out_shape=jax.ShapeDtypeStruct((Bp, Np), x.dtype),
        grid_spec=pltpu.PrefetchScalarGridSpec(
            num_scalar_prefetch=0,
            grid=grid,
            in_specs=[
                pl.BlockSpec((tm, tk), lambda i, j, k: (i, k)),   # x tile
                pl.BlockSpec((tn, tk), lambda i, j, k: (j, k)),   # V tile (N, K)
                pl.BlockSpec((1, tn), lambda i, j, k: (0, j)),    # bias tile
            ],
            out_specs=pl.BlockSpec((tm, tn), lambda i, j, k: (i, j)),
            scratch_shapes=[pltpu.VMEM((tm, tn), jnp.float32)],
        ),
        compiler_params=pltpu.CompilerParams(
            dimension_semantics=("parallel", "parallel", "arbitrary"),
        ),
    )(xp, Vp, bp)

    # Slice away the lane/sublane padding.
    if (Bp, Np) != (B, N):
        out_p = out_p[:B, :N]
    return out_p


if __name__ == "__main__":
    # Small shapes implied by forward(): x is (batch_size, input_dim).
    batch_size, input_dim, output_dim = 8, 32, 16

    key = jax.random.PRNGKey(0)
    kx, kv = jax.random.split(key)

    # Deterministic parameter init (xavier-uniform-style scaling for V, zeros for bias).
    limit = (6.0 / (input_dim + output_dim)) ** 0.5
    V = jax.random.uniform(kv, (output_dim, input_dim),
                           minval=-limit, maxval=limit, dtype=jnp.float32)
    bias = jnp.zeros((output_dim,), dtype=jnp.float32)

    x = jax.random.normal(kx, (batch_size, input_dim), dtype=jnp.float32)

    out = one_word_tensor_regression(x, V, bias)
    jax.block_until_ready(out)

    # Correctness check against plain-JAX reference of the einsum.
    ref = jnp.einsum('ik,bk->bi', V, x) + bias
    assert out.shape == (batch_size, output_dim)
    assert jnp.allclose(out, ref, atol=1e-5, rtol=1e-5)

    print("KERNEL_OK")
</pallas_src>

<mosaic_0001>
module attributes {stable_mosaic.version = 11 : i64} {
  func.func @_linear_kernel(%arg0: i32, %arg1: i32, %arg2: i32, %arg3: memref<8x128xf32, #tpu.memory_space<vmem>>, %arg4: memref<128x128xf32, #tpu.memory_space<vmem>>, %arg5: memref<1x128xf32, #tpu.memory_space<vmem>>, %arg6: memref<8x128xf32, #tpu.memory_space<vmem>>, %arg7: memref<8x128xf32, #tpu.memory_space<vmem>>) attributes {dimension_semantics = [#tpu.dimension_semantics<parallel>, #tpu.dimension_semantics<parallel>, #tpu.dimension_semantics<arbitrary>], iteration_bounds = array<i64: 1, 1, 1>, scalar_prefetch = 0 : i64, scratch_operands = 1 : i64, tpu.core_type = #tpu.core_type<tc>, window_params = [{transform_indices = @transform_0, window_bounds = array<i64: 8, 128>}, {transform_indices = @transform_1, window_bounds = array<i64: 128, 128>}, {transform_indices = @transform_2, window_bounds = array<i64: 1, 128>}, {transform_indices = @transform_3, window_bounds = array<i64: 8, 128>}]} {
    %c0_i32 = arith.constant 0 : i32
    %0 = arith.cmpi eq, %arg2, %c0_i32 : i32
    %1 = arith.extui %0 : i1 to i32
    %c0_i32_0 = arith.constant 0 : i32
    %2 = arith.cmpi ne, %1, %c0_i32_0 : i32
    scf.if %2 {
      %c0_10 = arith.constant 0 : index
      %c0_11 = arith.constant 0 : index
      %12 = vector.load %arg5[%c0_10, %c0_11] : memref<1x128xf32, #tpu.memory_space<vmem>>, vector<1x128xf32>
      %13 = vector.shape_cast %12 : vector<1x128xf32> to vector<1x128xf32>
      %14 = vector.broadcast %13 : vector<1x128xf32> to vector<8x128xf32>
      %c0_12 = arith.constant 0 : index
      %c0_13 = arith.constant 0 : index
      %15 = vector.load %arg7[%c0_12, %c0_13] : memref<8x128xf32, #tpu.memory_space<vmem>>, vector<8x128xf32>
      tpu.vector_store %arg7[%c0_12, %c0_13], %14 {strides = array<i32>} : memref<8x128xf32, #tpu.memory_space<vmem>>, vector<8x128xf32>,
    } else {
    }
    %c0 = arith.constant 0 : index
    %c0_1 = arith.constant 0 : index
    %3 = vector.load %arg7[%c0, %c0_1] : memref<8x128xf32, #tpu.memory_space<vmem>>, vector<8x128xf32>
    %c0_2 = arith.constant 0 : index
    %c0_3 = arith.constant 0 : index
    %4 = vector.load %arg3[%c0_2, %c0_3] : memref<8x128xf32, #tpu.memory_space<vmem>>, vector<8x128xf32>
    %c0_4 = arith.constant 0 : index
    %c0_5 = arith.constant 0 : index
    %5 = vector.load %arg4[%c0_4, %c0_5] : memref<128x128xf32, #tpu.memory_space<vmem>>, vector<128x128xf32>
    %cst = arith.constant dense<0.000000e+00> : vector<8x128xf32>
    %6 = tpu.matmul %4, %5, %cst {dimension_numbers = #tpu.dot_dimension_numbers<[1], [1], [0], [0], [0, 0, 1, 0], [], []>} : vector<8x128xf32>, vector<128x128xf32>, vector<8x128xf32> -> vector<8x128xf32>
    %7 = arith.addf %3, %6 : vector<8x128xf32>
    %c0_6 = arith.constant 0 : index
    %c0_7 = arith.constant 0 : index
    %8 = vector.load %arg7[%c0_6, %c0_7] : memref<8x128xf32, #tpu.memory_space<vmem>>, vector<8x128xf32>
    tpu.vector_store %arg7[%c0_6, %c0_7], %7 {strides = array<i32>} : memref<8x128xf32, #tpu.memory_space<vmem>>, vector<8x128xf32>,
    %c0_i32_8 = arith.constant 0 : i32
    %9 = arith.cmpi eq, %arg2, %c0_i32_8 : i32
    %10 = arith.extui %9 : i1 to i32
    %c0_i32_9 = arith.constant 0 : i32
    %11 = arith.cmpi ne, %10, %c0_i32_9 : i32
    scf.if %11 {
      %c0_10 = arith.constant 0 : index
      %c0_11 = arith.constant 0 : index
      %12 = vector.load %arg7[%c0_10, %c0_11] : memref<8x128xf32, #tpu.memory_space<vmem>>, vector<8x128xf32>
      %c0_12 = arith.constant 0 : index
      %c0_13 = arith.constant 0 : index
      %13 = vector.load %arg6[%c0_12, %c0_13] : memref<8x128xf32, #tpu.memory_space<vmem>>, vector<8x128xf32>
      tpu.vector_store %arg6[%c0_12, %c0_13], %12 {strides = array<i32>} : memref<8x128xf32, #tpu.memory_space<vmem>>, vector<8x128xf32>,
    } else {
    }
    return
  }
  func.func @transform_0(%arg0: i32, %arg1: i32, %arg2: i32) -> (i32, i32) {
    %c0_i32 = arith.constant 0 : i32
    return %arg0, %arg2 : i32, i32
  }
  func.func @transform_1(%arg0: i32, %arg1: i32, %arg2: i32) -> (i32, i32) {
    %c0_i32 = arith.constant 0 : i32
    return %arg1, %arg2 : i32, i32
  }
  func.func @transform_2(%arg0: i32, %arg1: i32, %arg2: i32) -> (i32, i32) {
    %c0_i32 = arith.constant 0 : i32
    %c0_i32_0 = arith.constant 0 : i32
    return %c0_i32, %arg1 : i32, i32
  }
  func.func @transform_3(%arg0: i32, %arg1: i32, %arg2: i32) -> (i32, i32) {
    %c0_i32 = arith.constant 0 : i32
    return %arg0, %arg1 : i32, i32
  }
}

</mosaic_0001>

<bundles_post_ra>
// kernel: tpu_custom_call.1
= control target key start
LH: loop header
LB: loop body
LE: loop exit
PB: predicated region body
PF: predicated region fallthrough
CT: control target
= control target key end

     0   :  { %8 = vsyncpa [#allocation4], 0  ;;  %s395_s0 = inlined_call_operand.hbm [shape: f32[8,128], index: 0, kind: input, shape index: {}]   ;;  %s396_s1 = inlined_call_operand.hbm [shape: f32[128,128], index: 1, kind: input, shape index: {}]   ;;  %s397_s2 = inlined_call_operand.vmem [shape: f32[1,128], index: 2, kind: input, shape index: {}]   ;;  %s398_s3 = inlined_call_operand.hbm [shape: f32[8,128], index: 3, kind: output, shape index: {}]  }
   0x1   :  { %9 = vsyncpa [#allocation7], 0 }
   0x2   :  { %10 = vsyncpa [#allocation5], 0  ;;  %s321_s12 = smov [#allocation3]   ;;  %s322_s14 = smov [#allocation6]  }
   0x3   :  { %s17_s13 = sshll.u32 %s321_s12, 4  ;;  %s26_s15 = sshll.u32 %s322_s14, 4  ;;  %s18_s13 = int_to_ptr.vmem [resolvable:$true] %s17_s13  ;;  %s349_s15 = int_to_ptr.vmem [resolvable:$true] %s26_s15 }
   0x4   :  { %s249_s18 = scalar_lea.hbm %s395_s0, 128 }
   0x5   :  { %p250_p0 = scmp.ne.s32.totalorder %s395_s0, %s249_s18  ;;  %p253_p1 = scmp.lt.u32.totalorder %s249_s18, %s395_s0 }
   0x7   :  { %p255_p2 = pnand %p253_p1, %p250_p0 }
   0x9   :  { %258 = shalt.err (!%p255_p2)
}
   0xa   :  { %s259_s23 = scalar_lea.vmem %s18_s13, 128  ;;  %p264_p4 = scmp.lt.s32.totalorder %s18_s13, %s18_s13 }
   0xb   :  { %p260_p3 = scmp.ne.s32.totalorder %s18_s13, %s259_s23  ;;  %p265_p5 = scmp.lt.s32.totalorder %s259_s23, %s259_s23 }
   0xd   :  { %p266_p6 = por %p265_p5, %p264_p4 }
   0xf   :  { %p267_p7 = pnand %p266_p6, %p260_p3 }
  0x11   :  { %270 = shalt.err (!%p267_p7)
}
  0x12   :  { %20 = dma.hbm_to_vmem [thread:$0]  %s395_s0, 128, %s18_s13, [#allocation4]  }
  0x13   :  { %s271_s28 = scalar_lea.hbm %s396_s1, 2048 }
  0x14   :  { %p272_p8 = scmp.ne.s32.totalorder %s396_s1, %s271_s28  ;;  %p275_p9 = scmp.lt.u32.totalorder %s271_s28, %s396_s1 }
  0x16   :  { %p277_p10 = pnand %p275_p9, %p272_p8 }
  0x18   :  { %280 = shalt.err (!%p277_p10)
}
  0x19   :  { %s281_s6 = scalar_lea.vmem %s349_s15, 2048  ;;  %p286_p12 = scmp.lt.s32.totalorder %s349_s15, %s349_s15 }
  0x1a   :  { %p282_p11 = scmp.ne.s32.totalorder %s349_s15, %s281_s6  ;;  %p287_p13 = scmp.lt.s32.totalorder %s281_s6, %s281_s6 }
  0x1c   :  { %p288_p0 = por %p287_p13, %p286_p12 }
  0x1e   :  { %p289_p1 = pnand %p288_p0, %p282_p11 }
  0x20   :  { %292 = shalt.err (!%p289_p1)
}
  0x21   :  { %s323_s0 = smov 128   ;;  %s324_s7 = smov 8  }
  0x22   :  { %32 = dma.hbm_to_vmem [thread:$0]  %s396_s1, 2048, %s349_s15, [#allocation7], %s323_s0, %s323_s0, %s324_s7  }
  0x23   :  { %315 = dma.done.wait [#allocation4], 128  }
  0x24   :  { %316 = vsyncadd [#allocation4], 4294967168 }
  0x25   :  { %317 = dma.done.wait [#allocation7], 2048  }
  0x26   :  { %318 = vsyncadd [#allocation7], 4294965248  ;;  %v325_v0 = vmov 0.0|0.0   ;;  %vm326_vm0 = vmmov 0   ;;  %v327_v1 = vmov 0.0   ;;  %v55_v2 = vld [vmem:[#allocation6] sm:$0xff] }
  0x27   :  { %217 = vmatprep.subr.bf16.mxu0 %v325_v0  ;;  %214 = vmatprep.mubr.msk.f32.mxu0 %vm326_vm0, %v327_v1  ;;  %v56_v3 = vld [vmem:[#allocation6 + $0x8] sm:$0xff]  ;;  %v57_v5 = vld [vmem:[#allocation6 + $0x10] sm:$0xff]  ;;  %v58_v6 = vld [vmem:[#allocation6 + $0x18] sm:$0xff]  ;;  %s328_s11 = smov [#allocation8]  }
  0x28   :  { %v218_v4 = vpack.c.bf16 %v56_v3, %v55_v2  ;;  %v221_v7 = vpack.c.bf16 %v58_v6, %v57_v5  ;;  %v59_v8 = vld [vmem:[#allocation6 + $0x20] sm:$0xff]  ;;  %v60_v9 = vld [vmem:[#allocation6 + $0x28] sm:$0xff]  ;;  %v61_v11 = vld [vmem:[#allocation6 + $0x30] sm:$0xff]  ;;  %s154_s12 = sshll.u32 %s328_s11, 4  ;;  %s155_s12 = int_to_ptr.vmem [resolvable:$true] %s154_s12 }
  0x29   :  { %v224_v10 = vpack.c.bf16 %v60_v9, %v59_v8  ;;  %v62_v12 = vld [vmem:[#allocation6 + $0x38] sm:$0xff]  ;;  %v63_v14 = vld [vmem:[#allocation6 + $0x40] sm:$0xff]  ;;  %v64_v15 = vld [vmem:[#allocation6 + $0x48] sm:$0xff]  ;;  %s293_s13 = scalar_lea.vmem %s155_s12, 128  ;;  %p298_p3 = scmp.lt.s32.totalorder %s155_s12, %s155_s12 }
  0x2a   :  { %219 = vmatpush3.bf16.xpose.msra.mxu0 %v218_v4  ;;  %v227_v13 = vpack.c.bf16 %v62_v12, %v61_v11  ;;  %v230_v16 = vpack.c.bf16 %v64_v15, %v63_v14  ;;  %v65_v17 = vld [vmem:[#allocation6 + $0x50] sm:$0xff]  ;;  %v66_v18 = vld [vmem:[#allocation6 + $0x58] sm:$0xff]  ;;  %v67_v20 = vld [vmem:[#allocation6 + $0x60] sm:$0xff]  ;;  %p294_p2 = scmp.ne.s32.totalorder %s155_s12, %s293_s13  ;;  %p299_p4 = scmp.lt.s32.totalorder %s293_s13, %s293_s13 }
  0x2b   :  { %220 = vmatprep.subr.bf16.mxu0 %v325_v0  ;;  %v233_v19 = vpack.c.bf16 %v66_v18, %v65_v17  ;;  %v68_v21 = vld [vmem:[#allocation6 + $0x68] sm:$0xff]  ;;  %v69_v23 = vld [vmem:[#allocation6 + $0x70] sm:$0xff]  ;;  %v70_v24 = vld [vmem:[#allocation6 + $0x78] sm:$0xff] }
  0x2c   :  { %v236_v22 = vpack.c.bf16 %v68_v21, %v67_v20  ;;  %v239_v25 = vpack.c.bf16 %v70_v24, %v69_v23  ;;  %v54_v26 = vld [vmem:[#allocation3] sm:$0xff]  ;;  %p300_p5 = por %p299_p4, %p298_p3 }
  0x2d   :  { %v164_v27 = vld [vmem:[%s397_s2] ss:$0 sm:$0xff] }
  0x2e   :  { %p301_p6 = pnand %p300_p5, %p294_p2 }
  0x32   :  { %222 = vmatpush3.bf16.xpose.msra.mxu0 %v221_v7 }
  0x33   :  { %223 = vmatprep.subr.bf16.mxu0 %v325_v0 }
  0x3a   :  { %225 = vmatpush3.bf16.xpose.msra.mxu0 %v224_v10 }
  0x3b   :  { %226 = vmatprep.subr.bf16.mxu0 %v325_v0 }
  0x42   :  { %228 = vmatpush3.bf16.xpose.msra.mxu0 %v227_v13 }
  0x43   :  { %229 = vmatprep.subr.bf16.mxu0 %v325_v0 }
  0x4a   :  { %231 = vmatpush3.bf16.xpose.msra.mxu0 %v230_v16 }
  0x4b   :  { %232 = vmatprep.subr.bf16.mxu0 %v325_v0 }
  0x52   :  { %234 = vmatpush3.bf16.xpose.msra.mxu0 %v233_v19 }
  0x53   :  { %235 = vmatprep.subr.bf16.mxu0 %v325_v0 }
  0x5a   :  { %237 = vmatpush3.bf16.xpose.msra.mxu0 %v236_v22 }
  0x5b   :  { %238 = vmatprep.subr.bf16.mxu0 %v325_v0 }
  0x62   :  { %240 = vmatpush3.bf16.xpose.msra.mxu0 %v239_v25 }
  0x69   :  { %215 = vmatmul.mubr.f32.vlgmr.msra.gmra.mrb[0].mxu0 %v54_v26 }
 0x13c   :  { %v137_v28 = vpop.f32.mrb[0].mxu0 }
 0x13d   :  { %v141_v29 = vadd.f32 %v164_v27, %v137_v28  ;;  %v216_v30 = vpop.f32.mrb[1].mxu0 }
 0x13f   :  { %147 = vst [vmem:[#allocation8] sm:$0xff] %v141_v29 }
 0x140   :  { %304 = shalt.err (!%p301_p6)
}
 0x141   :  { %s305_s16 = scalar_lea.hbm %s398_s3, 128 }
 0x142   :  { %p306_p7 = scmp.ne.s32.totalorder %s398_s3, %s305_s16  ;;  %p309_p8 = scmp.lt.u32.totalorder %s305_s16, %s398_s3 }
 0x144   :  { %p311_p9 = pnand %p309_p8, %p306_p7 }
 0x146   :  { %314 = shalt.err (!%p311_p9)
}
 0x147   :  { %157 = dma.vmem_to_hbm [thread:$0]  %s155_s12, 128, %s398_s3, [#allocation5]  }
 0x148   :  { %319 = dma.done.wait [#allocation5], 128  }
 0x149   :  { %320 = vsyncadd [#allocation5], 4294967168 }
 0x14a   :  { %161 = vsyncpa [#allocation4], 1 }
 0x14b   :  { %162 = vsyncpa [#allocation7], 1 }
 0x14c   :  { %163 = vsyncpa [#allocation5], 1 }

</bundles_post_ra>
